<compile_context>
chip_gen: v7x
topology: tpu7x:2x2x1
jax: 0.10.0
libtpu: 0.0.40
codegen_flags: <defaults>
</compile_context>

<pallas_src>
import functools

import jax
import jax.numpy as jnp
from jax.experimental import pallas as pl
from jax.experimental.pallas import tpu as pltpu


def _bessel_kernel(r_ref, omega_ref, coef_ref, out_ref):
    # r_ref:     (1, TN)  tile of distances (lane-dense)
    # omega_ref: (R, 1)   alpha * pi / rc
    # coef_ref:  (R, 1)   prefactor / beta
    # out_ref:   (R, TN)  transposed output tile (lane-dense stores)
    r = r_ref[...]                       # (1, TN)
    inv_r = 1.0 / r                      # narrow divide: TN elements, not R*TN
    arg = omega_ref[...] * r             # (R, TN)
    out_ref[...] = jnp.sin(arg) * coef_ref[...] * inv_r


def _bessel_kernel_cutoff(r_ref, cut_ref, omega_ref, coef_ref, out_ref):
    # Same as above but folds the cutoff envelope into the narrow 1/r factor.
    r = r_ref[...]                       # (1, TN)
    scale = cut_ref[...] / r             # (1, TN)  cutoff(r) / r in one narrow divide
    arg = omega_ref[...] * r             # (R, TN)
    out_ref[...] = jnp.sin(arg) * coef_ref[...] * scale


def bessel_function(r, alpha, beta, *, rc, cutoff=None, block_n=2048):
    """Pallas implementation of Bessel_Function.forward.

    Args:
      r:      (N,) or (N, 1) float32 distances.
      alpha:  (1, num_radial) float32 parameter.
      beta:   (1, num_radial) float32 parameter.
      rc:     cutoff radius (python float, != 0).
      cutoff: optional (N,) or (N, 1) float32 envelope.
      block_n: N-axis tile size (rounded up to a multiple of 128).

    Returns:
      (N, num_radial) float32 radial basis values.
    """
    r_flat = r.reshape(-1).astype(jnp.float32)
    n = r_flat.shape[0]
    num_radial = alpha.shape[-1]
    prefactor = (2.0 / float(rc)) ** 0.5

    # Hoist the parameter algebra out of the per-element path (tiny, done by XLA once).
    omega = (alpha.reshape(num_radial, 1).astype(jnp.float32) * (jnp.pi / float(rc)))
    coef = prefactor / beta.reshape(num_radial, 1).astype(jnp.float32)

    # Choose a lane-aligned tile; shrink it for small N so padding stays modest.
    block_n = max(128, int(block_n))
    block_n = ((block_n + 127) // 128) * 128
    block_n_eff = min(block_n, ((n + 127) // 128) * 128)
    n_pad = pl.cdiv(n, block_n_eff) * block_n_eff
    grid = (n_pad // block_n_eff,)

    # Pad r with 1.0 (never 0.0 -> avoids inf/NaN from 1/r); padded rows are sliced off.
    r2 = jnp.pad(r_flat, (0, n_pad - n), constant_values=1.0).reshape(1, n_pad)

    r_spec = pl.BlockSpec((1, block_n_eff), lambda i: (0, i))
    param_spec = pl.BlockSpec((num_radial, 1), lambda i: (0, 0))
    out_spec = pl.BlockSpec((num_radial, block_n_eff), lambda i: (0, i))

    if cutoff is None:
        kernel = _bessel_kernel
        in_specs = [r_spec, param_spec, param_spec]
        args = (r2, omega, coef)
    else:
        cut_flat = cutoff.reshape(-1).astype(jnp.float32)
        cut2 = jnp.pad(cut_flat, (0, n_pad - n), constant_values=0.0).reshape(1, n_pad)
        kernel = _bessel_kernel_cutoff
        in_specs = [r_spec, r_spec, param_spec, param_spec]
        args = (r2, cut2, omega, coef)

    out_t = pl.pallas_call(
        kernel,
        out_shape=jax.ShapeDtypeStruct((num_radial, n_pad), jnp.float32),
        grid_spec=pltpu.PrefetchScalarGridSpec(
            num_scalar_prefetch=0,
            grid=grid,
            in_specs=in_specs,
            out_specs=out_spec,
        ),
        compiler_params=pltpu.CompilerParams(
            dimension_semantics=("parallel",)
        ),
    )(*args)

    # Back to the PyTorch layout (N, num_radial); drop the padded rows.
    return out_t[:, :n].T


def make_params(num_radial, weighting=True, inital_beta=2.0):
    """Deterministic parameter init matching Bessel_Function.__init__."""
    if weighting:
        alpha = jnp.arange(0, num_radial, dtype=jnp.float32).reshape(1, num_radial)
        beta = jnp.full((1, num_radial), inital_beta, dtype=jnp.float32)
    else:
        alpha = jnp.arange(1, num_radial + 1, dtype=jnp.float32).reshape(1, num_radial)
        beta = jnp.ones((1, num_radial), dtype=jnp.float32)
    return alpha, beta


def bessel_reference(r, alpha, beta, *, rc, cutoff=None):
    """Plain-JAX reference mirroring the PyTorch forward exactly."""
    r2 = r.reshape(-1, 1)
    prefactor = (2.0 / rc) ** 0.5
    rbf = prefactor * jnp.sin(alpha * jnp.pi * r2 / rc) / (beta * r2)
    if cutoff is not None:
        rbf = rbf * cutoff.reshape(-1, 1)
    return rbf


if __name__ == "__main__":
    num_radial = 8
    rc = 5.0

    alpha, beta = make_params(num_radial, weighting=True, inital_beta=2.0)

    key = jax.random.PRNGKey(0)
    k_r, k_c, k_r2, k_c2 = jax.random.split(key, 4)

    # --- Small case (exercises padding: 16 -> 128) ---
    n_edges = 16
    r = jax.random.uniform(k_r, (n_edges,), dtype=jnp.float32, minval=0.5, maxval=rc)
    cutoff = jax.random.uniform(k_c, (n_edges,), dtype=jnp.float32, minval=0.0, maxval=1.0)

    out = jax.block_until_ready(bessel_function(r, alpha, beta, rc=rc, cutoff=None))
    ref = bessel_reference(r, alpha, beta, rc=rc, cutoff=None)
    assert out.shape == (n_edges, num_radial)
    assert jnp.allclose(out, ref, atol=1e-5, rtol=1e-5)

    out_c = jax.block_until_ready(bessel_function(r, alpha, beta, rc=rc, cutoff=cutoff))
    ref_c = bessel_reference(r, alpha, beta, rc=rc, cutoff=cutoff)
    assert jnp.allclose(out_c, ref_c, atol=1e-5, rtol=1e-5)

    # --- Multi-tile case (exercises grid > 1 and ragged N with padding) ---
    n_edges2 = 300
    r_big = jax.random.uniform(k_r2, (n_edges2,), dtype=jnp.float32, minval=0.5, maxval=rc)
    cut_big = jax.random.uniform(k_c2, (n_edges2,), dtype=jnp.float32, minval=0.0, maxval=1.0)

    out_b = jax.block_until_ready(
        bessel_function(r_big, alpha, beta, rc=rc, cutoff=cut_big, block_n=128))
    ref_b = bessel_reference(r_big, alpha, beta, rc=rc, cutoff=cut_big)
    assert out_b.shape == (n_edges2, num_radial)
    assert jnp.allclose(out_b, ref_b, atol=1e-5, rtol=1e-5)

    print("KERNEL_OK")
</pallas_src>

<mosaic_0001>
module attributes {stable_mosaic.version = 11 : i64} {
  func.func @_bessel_kernel(%arg0: i32, %arg1: memref<1x128xf32, #tpu.memory_space<vmem>>, %arg2: memref<8x1xf32, #tpu.memory_space<vmem>>, %arg3: memref<8x1xf32, #tpu.memory_space<vmem>>, %arg4: memref<8x128xf32, #tpu.memory_space<vmem>>) attributes {dimension_semantics = [#tpu.dimension_semantics<parallel>], iteration_bounds = array<i64: 1>, scalar_prefetch = 0 : i64, scratch_operands = 0 : i64, tpu.core_type = #tpu.core_type<tc>, window_params = [{transform_indices = @transform_0, window_bounds = array<i64: 1, 128>}, {pipeline_mode = #tpu.pipeline_mode<synchronous>, transform_indices = @transform_1, window_bounds = array<i64: 8, 1>}, {pipeline_mode = #tpu.pipeline_mode<synchronous>, transform_indices = @transform_2, window_bounds = array<i64: 8, 1>}, {transform_indices = @transform_3, window_bounds = array<i64: 8, 128>}]} {
    %c0 = arith.constant 0 : index
    %c0_0 = arith.constant 0 : index
    %0 = vector.load %arg1[%c0, %c0_0] : memref<1x128xf32, #tpu.memory_space<vmem>>, vector<1x128xf32>
    %cst = arith.constant 1.000000e+00 : f32
    %1 = vector.broadcast %cst : f32 to vector<1x128xf32>
    %2 = arith.divf %1, %0 : vector<1x128xf32>
    %c0_1 = arith.constant 0 : index
    %c0_2 = arith.constant 0 : index
    %3 = vector.load %arg2[%c0_1, %c0_2] : memref<8x1xf32, #tpu.memory_space<vmem>>, vector<8x1xf32>
    %4 = vector.broadcast %3 : vector<8x1xf32> to vector<8x128xf32>
    %5 = vector.broadcast %0 : vector<1x128xf32> to vector<8x128xf32>
    %6 = arith.mulf %4, %5 : vector<8x128xf32>
    %7 = math.sin %6 : vector<8x128xf32>
    %c0_3 = arith.constant 0 : index
    %c0_4 = arith.constant 0 : index
    %8 = vector.load %arg3[%c0_3, %c0_4] : memref<8x1xf32, #tpu.memory_space<vmem>>, vector<8x1xf32>
    %9 = vector.broadcast %8 : vector<8x1xf32> to vector<8x128xf32>
    %10 = arith.mulf %7, %9 : vector<8x128xf32>
    %11 = vector.broadcast %2 : vector<1x128xf32> to vector<8x128xf32>
    %12 = arith.mulf %10, %11 : vector<8x128xf32>
    %c0_5 = arith.constant 0 : index
    %c0_6 = arith.constant 0 : index
    %13 = vector.load %arg4[%c0_5, %c0_6] : memref<8x128xf32, #tpu.memory_space<vmem>>, vector<8x128xf32>
    tpu.vector_store %arg4[%c0_5, %c0_6], %12 {strides = array<i32>} : memref<8x128xf32, #tpu.memory_space<vmem>>, vector<8x128xf32>,
    return
  }
  func.func @transform_0(%arg0: i32) -> (i32, i32) {
    %c0_i32 = arith.constant 0 : i32
    %c0_i32_0 = arith.constant 0 : i32
    return %c0_i32, %arg0 : i32, i32
  }
  func.func @transform_1(%arg0: i32) -> (i32, i32) {
    %c0_i32 = arith.constant 0 : i32
    %c0_i32_0 = arith.constant 0 : i32
    %c0_i32_1 = arith.constant 0 : i32
    return %c0_i32, %c0_i32_0 : i32, i32
  }
  func.func @transform_2(%arg0: i32) -> (i32, i32) {
    %c0_i32 = arith.constant 0 : i32
    %c0_i32_0 = arith.constant 0 : i32
    %c0_i32_1 = arith.constant 0 : i32
    return %c0_i32, %c0_i32_0 : i32, i32
  }
  func.func @transform_3(%arg0: i32) -> (i32, i32) {
    %c0_i32 = arith.constant 0 : i32
    %c0_i32_0 = arith.constant 0 : i32
    return %c0_i32, %arg0 : i32, i32
  }
}

</mosaic_0001>

<bundles_post_ra>
// kernel: tpu_custom_call.1
= control target key start
LH: loop header
LB: loop body
LE: loop exit
PB: predicated region body
PF: predicated region fallthrough
CT: control target
= control target key end

     0   :  { %v211_v1 = vmov 0   ;;  %s292_s0 = inlined_call_operand.vmem [shape: f32[1,128], index: 0, kind: input, shape index: {}]   ;;  %s293_s1 = inlined_call_operand.vmem [shape: f32[8,1], index: 1, kind: input, shape index: {}]   ;;  %s294_s2 = inlined_call_operand.vmem [shape: f32[8,1], index: 2, kind: input, shape index: {}]   ;;  %s295_s3 = inlined_call_operand.hbm [shape: f32[8,128], index: 3, kind: output, shape index: {}]  }
   0x1   :  { %v18_v0 = vld [vmem:[%s293_s1] sm:$0xff]  ;;  %180 = vset.pattern.permute.xlu0 %v211_v1 }
   0x2   :  { %21 = vperm.xlu0 %180, %v18_v0  }
   0x3   :  { %8 = vsyncpa [#allocation3], 0  ;;  %v135_v2 = vld [vmem:[%s294_s2] sm:$0xff]  ;;  %v25_v3 = vlaneseq  ;;  %v212_v21 = vmov 2102212464  }
   0x4   :  { %v251_v6 = vld [vmem:[%s292_s0] sm:$0x1]  ;;  %v213_v23 = vmov 920167782   ;;  %v214_v27 = vmov 1326507024  }
   0x5   :  { %v245_v4 = vshrl.u32 %v25_v3, 7  ;;  %v215_v29 = vmov 683565275   ;;  %v216_v31 = vmov 2475754826   ;;  %s218_s0 = smov [#allocation2]  }
   0x6   :  { %138 = vperm.xlu0 %180, %v135_v2   ;;  %v217_v34 = vmov 2131351028   ;;  %s156_s1 = sshll.u32 %s218_s0, 4  ;;  %s157_s1 = int_to_ptr.vmem [resolvable:$true] %s156_s1 }
   0x7   :  { %v27_v5 = vsub.s32 0, %v245_v4  ;;  %s187_s2 = scalar_lea.vmem %s157_s1, 128  ;;  %p192_p1 = scmp.lt.s32.totalorder %s157_s1, %s157_s1 }
   0x8   :  { %p188_p0 = scmp.ne.s32.totalorder %s157_s1, %s187_s2  ;;  %p193_p2 = scmp.lt.s32.totalorder %s187_s2, %s187_s2 }
   0x9   :  { %v28_v7 = vrot.slane %v251_v6, %v27_v5 }
   0xa   :  { %p194_p3 = por %p193_p2, %p192_p1 }
   0xc   :  { %p195_p4 = pnand %p194_p3, %p188_p0 }
  0x81   :  { %v22_v8 = vpop.permute.xlu0 %21 }
  0x82   :  { %v256_v9 = vmul.f32 %v28_v7, %v22_v8 }
  0x84   :  { %v34_v10 = vand.u32 2139095040, %v256_v9  ;;  %v31_v11 = vand.u32 2147483647, %v256_v9  ;;  %vm33_vm7 = vcmp.lt.s32.totalorder %v256_v9, 0  ;;  %vm123_vm12 = vweird.f32 %v256_v9 }
  0x86   :  { %v35_v12 = vshrl.u32 %v34_v10, 23  ;;  %v38_v14 = vand.u32 8388607, %v31_v11  ;;  %vm32_vm8 = vcmp.le.f32.partialorder %v31_v11, 0.7853982 }
  0x88   :  { %v164_v13 = vadd.s32 4294967169, %v35_v12  ;;  %v39_v17 = vor.u32 8388608, %v38_v14 }
  0x8a   :  { %v41_v15 = vadd.s32 1, %v164_v13  ;;  %v79_v25 = vshll.u32 %v39_v17, 8 }
  0x8c   :  { %vm42_vm0 = vcmp.gt.s32.totalorder %v41_v15, 0 }
  0x8d   :  { %v43_v16 = vsel %vm42_vm0, %v41_v15, 0 }
  0x8e   :  { %v45_v18 = vand.u32 31, %v43_v16  ;;  %v44_v19 = vshrl.u32 %v43_v16, 5 }
  0x90   :  { %v46_v20 = vsub.s32 32, %v45_v18  ;;  %v57_v22 = vshll.u32 %v212_v21, %v45_v18  ;;  %v60_v24 = vshll.u32 %v213_v23, %v45_v18  ;;  %v48_v30 = vshll.u32 %v215_v29, %v45_v18 }
  0x91   :  { %v51_v33 = vshll.u32 %v216_v31, %v45_v18  ;;  %v54_v36 = vshll.u32 %v217_v34, %v45_v18  ;;  %vm66_vm1 = vcmp.lt.s32.totalorder %v44_v19, 4  ;;  %vm63_vm2 = vcmp.lt.s32.totalorder %v44_v19, 1 }
  0x92   :  { %v58_v26 = vshrl.u32 %v213_v23, %v46_v20  ;;  %v61_v28 = vshrl.u32 %v214_v27, %v46_v20  ;;  %v49_v32 = vshrl.u32 %v216_v31, %v46_v20  ;;  %v52_v35 = vshrl.u32 %v217_v34, %v46_v20 }
  0x93   :  { %v55_v37 = vshrl.u32 %v212_v21, %v46_v20  ;;  %v47_v41 = vshrl.u32 %v215_v29, %v46_v20  ;;  %vm64_vm3 = vcmp.lt.s32.totalorder %v44_v19, 2  ;;  %vm65_vm4 = vcmp.lt.s32.totalorder %v44_v19, 3 }
  0x94   :  { %v59_v38 = vor.u32 %v58_v26, %v57_v22  ;;  %v62_v39 = vor.u32 %v61_v28, %v60_v24  ;;  %v50_v40 = vor.u32 %v49_v32, %v48_v30  ;;  %v53_v42 = vor.u32 %v52_v35, %v51_v33 }
  0x95   :  { %v56_v43 = vor.u32 %v55_v37, %v54_v36 }
  0x96   :  { %v72_v44 = vsel %vm66_vm1, %v59_v38, 920167782  ;;  %v76_v45 = vsel %vm66_vm1, %v62_v39, 1326507024  ;;  %v71_v47 = vsel %vm63_vm2, %v50_v40, %v53_v42  ;;  %v67_v50 = vsel %vm63_vm2, %v47_v41, %v50_v40 }
  0x97   :  { %v68_v46 = vsel %vm66_vm1, %v56_v43, 2102212464  ;;  %v73_v48 = vsel %vm65_vm4, %v56_v43, %v72_v44  ;;  %v75_v49 = vsel %vm63_vm2, %v53_v42, %v56_v43  ;;  %v77_v53 = vsel %vm65_vm4, %v59_v38, %v76_v45 }
  0x98   :  { %v69_v51 = vsel %vm65_vm4, %v53_v42, %v68_v46  ;;  %v74_v52 = vsel %vm64_vm3, %v71_v47, %v73_v48  ;;  %v78_v54 = vsel %vm64_vm3, %v75_v49, %v77_v53  ;;  %v139_v42 = vpop.permute.xlu0 %138 }
  0x99   :  { %v262_v55 = vmul.u32.u64.low %v79_v25, %v74_v52  ;;  %v263_v56 = vmul.u32.u64.high %v79_v25, %v74_v52, %v262_v55  ;;  %v265_v57 = vmul.u32.u64.low %v79_v25, %v78_v54  ;;  %v266_v58 = vmul.u32.u64.high %v79_v25, %v78_v54, %v265_v57 }
  0x9a   :  { %v70_v59 = vsel %vm64_vm3, %v67_v50, %v69_v51 }
  0x9b   :  { %v89_v60 = vadd.s32 1, %v263_v56  ;;  %v86_v61 = vmul.u32 %v79_v25, %v70_v59  ;;  %vm88_vm5 = vc.u32 %v266_v58, %v262_v55  ;;  %v87_v14 = vadd.s32 %v262_v55, %v266_v58 }
  0x9d   :  { %v90_v62 = vsel %vm88_vm5, %v89_v60, %v263_v56 }
  0x9e   :  { %v91_v63 = vadd.s32 %v90_v62, %v86_v61 }
  0xa0   :  { %v92_v0 = vadd.s32 536870912, %v91_v63 }
  0xa2   :  { %v93_v1 = vshrl.u32 %v92_v0, 30 }
  0xa4   :  { %v94_v2 = vshll.u32 %v93_v1, 30  ;;  %v117_v26 = vsub.s32 4, %v93_v1 }
  0xa6   :  { %v95_v3 = vsub.s32 %v91_v63, %v94_v2  ;;  %v118_v29 = vsel %vm33_vm7, %v117_v26, %v93_v1 }
  0xa7   :  { %v120_v31 = vsel %vm32_vm8, 0, %v118_v29 }
  0xa8   :  { %v97_v7 = vsub.s32 0, %v95_v3  ;;  %v124_v32 = vadd.s32 3, %v120_v31 }
  0xaa   :  { %v165_v8 = vmin.u32 %v97_v7, %v95_v3  ;;  %v125_v33 = vand.u32 3, %v124_v32 }
  0xac   :  { %v99_v10 = vclz %v165_v8  ;;  %vm130_vm9 = vcmp.eq.s32.totalorder %v125_v33, 2  ;;  %vm127_vm10 = vcmp.eq.s32.totalorder %v125_v33, 0  ;;  %vm126_vm11 = vcmp.lt.s32.totalorder %v125_v33, 2 }
  0xae   :  { %v166_v12 = vadd.s32 4294967294, %v99_v10 }
  0xb0   :  { %vm167_vm6 = vcmp.lt.s32.totalorder %v166_v12, 0 }
  0xb1   :  { %v102_v13 = vsel %vm167_vm6, 0, %v166_v12 }
  0xb2   :  { %v103_v15 = vsub.s32 32, %v102_v13  ;;  %v107_v16 = vsub.s32 4294967266, %v102_v13  ;;  %v104_v17 = vshll.u32 %v95_v3, %v102_v13 }
  0xb4   :  { %v105_v18 = vshrl.u32 %v87_v14, %v103_v15  ;;  %v108_v19 = vadd.s32 127, %v107_v16 }
  0xb6   :  { %v106_v20 = vor.u32 %v105_v18, %v104_v17  ;;  %v109_v21 = vshll.u32 %v108_v19, 23 }
  0xb8   :  { %v110_v22 = vor.u32 4788187, %v109_v21  ;;  %v113_v24 = vcvt.s32.f32 %v106_v20 }
  0xba   :  { %v111_v23 = vand.u32 2147483647, %v110_v22 }
  0xbc   :  { %v114_v25 = vmul.f32 %v113_v24, %v111_v23 }
  0xbe   :  { %v115_v27 = vxor.u32 2147483648, %v114_v25 }
  0xc0   :  { %v116_v28 = vsel %vm33_vm7, %v115_v27, %v114_v25 }
  0xc1   :  { %v119_v30 = vsel %vm32_vm8, %v256_v9, %v116_v28 }
  0xc2   :  { %181 = vcosq.f32 %v119_v30 }
  0xc3   :  { %183 = vsinq.f32 %v119_v30 }
  0xc4   :  { %185 = vrcp.f32 %v251_v6 }
  0xcc   :  { %v182_v34 = vpop.eup %181 }
  0xcd   :  { %v184_v35 = vpop.eup %183  ;;  %v131_v36 = vxor.u32 2147483648, %v182_v34 }
  0xce   :  { %v186_v37 = vpop.eup %185  ;;  %v128_v38 = vxor.u32 2147483648, %v184_v35 }
  0xcf   :  { %v132_v39 = vsel %vm130_vm9, %v131_v36, %v184_v35  ;;  %v146_v41 = vrot.slane %v186_v37, %v27_v5 }
  0xd0   :  { %v129_v11 = vsel %vm127_vm10, %v182_v34, %v128_v38 }
  0xd1   :  { %v133_v40 = vsel %vm126_vm11, %v129_v11, %v132_v39 }
  0xd2   :  { %v134_v6 = vsel %vm123_vm12, nan, %v133_v40 }
  0xd3   :  { %v141_v43 = vmul.f32 %v139_v42, %v134_v6 }
  0xd5   :  { %v148_v44 = vmul.f32 %v146_v41, %v141_v43 }
  0xd7   :  { %149 = vst [vmem:[#allocation2] sm:$0xff] %v148_v44 }
  0xd8   :  { %198 = shalt.err (!%p195_p4)
}
  0xd9   :  { %s199_s20 = scalar_lea.hbm %s295_s3, 128 }
  0xda   :  { %p200_p5 = scmp.ne.s32.totalorder %s295_s3, %s199_s20  ;;  %p203_p6 = scmp.lt.u32.totalorder %s199_s20, %s295_s3 }
  0xdc   :  { %p205_p7 = pnand %p203_p6, %p200_p5 }
  0xde   :  { %208 = shalt.err (!%p205_p7)
}
  0xdf   :  { %159 = dma.vmem_to_hbm [thread:$0]  %s157_s1, 128, %s295_s3, [#allocation3]  }
  0xe0   :  { %209 = dma.done.wait [#allocation3], 128  }
  0xe1   :  { %210 = vsyncadd [#allocation3], 4294967168 }
  0xe2   :  { %163 = vsyncpa [#allocation3], 1 }

</bundles_post_ra>
